<compile_context>
chip_gen: v7x
topology: tpu7x:2x2x1
jax: 0.10.0
libtpu: 0.0.40
codegen_flags: <defaults>
</compile_context>

<pallas_src>
import functools

import jax
import jax.numpy as jnp
from jax.experimental import pallas as pl
from jax.experimental.pallas import tpu as pltpu

EPS = 1e-5  # PyTorch nn.LayerNorm default


def _round_up(x, m):
    return (x + m - 1) // m * m


@functools.lru_cache(maxsize=None)
def _vmem_cap_bytes():
    """Per-core VMEM capacity with ~15% headroom (conservative v7x fallback)."""
    cap = 64 << 20
    try:
        cap = int(pltpu.get_tpu_info().vmem_capacity_bytes)
    except Exception:
        pass
    return int(cap * 0.85)


def _make_kernel(d_real, d_pad, compute_dtype):
    """Builds the fused kernel for a given (real, padded) feature size."""
    inv_d = 1.0 / float(d_real)
    needs_mask = d_pad != d_real

    def layer_norm(h, gamma, beta, mask):
        # Padded feature columns of `h` are exactly zero by construction
        # (weights/biases zero-padded), so the plain sum over d_pad equals the
        # sum over the real d features.
        mu = jnp.sum(h, axis=-1, keepdims=True) * inv_d
        c = h - mu
        if mask is not None:
            c = jnp.where(mask, c, 0.0)   # keep padded cols out of the variance
        var = jnp.sum(c * c, axis=-1, keepdims=True) * inv_d
        return c * jax.lax.rsqrt(var + EPS) * gamma + beta

    def kernel(x_ref, w1_ref, b1_ref, g1_ref, be1_ref,
               w2_ref, b2_ref, g2_ref, be2_ref, o_ref):
        mask = None
        if needs_mask:  # hoisted: one iota/compare, reused by both LayerNorms
            lane = jax.lax.broadcasted_iota(jnp.int32, (1, d_pad), 1)
            mask = lane < d_real

        # fc1: x @ W1^T + b1  (MXU in compute_dtype, f32 accumulation)
        h = jnp.dot(x_ref[...].astype(compute_dtype), w1_ref[...],
                    preferred_element_type=jnp.float32) + b1_ref[...]
        h = jnp.maximum(layer_norm(h, g1_ref[...], be1_ref[...], mask), 0.0)

        # fc2
        h2 = jnp.dot(h.astype(compute_dtype), w2_ref[...],
                     preferred_element_type=jnp.float32) + b2_ref[...]
        h2 = layer_norm(h2, g2_ref[...], be2_ref[...], mask)

        # Residual + ReLU. Re-read x_ref here instead of holding an f32 x tile
        # live across both matmuls (reduces live vreg/VMEM pressure per tile).
        out = jnp.maximum(h2 + x_ref[...].astype(jnp.float32), 0.0)
        o_ref[...] = out.astype(o_ref.dtype)

    return kernel


def prepare_params(params, *, compute_dtype=jnp.bfloat16):
    """One-time parameter prep: zero-pad feature dims to a multiple of 128 and
    cast the matmul weights to the MXU compute dtype. Call once, reuse across
    forward calls (avoids re-padding / re-casting the weights every call)."""
    Dp = _round_up(params["w1"].shape[0], 128)
    cdt = jnp.dtype(compute_dtype)

    def pad2(a, r, c):
        return jnp.pad(a, ((0, r - a.shape[0]), (0, c - a.shape[1])))

    return dict(
        w1=pad2(params["w1"], Dp, Dp).astype(cdt),   # (in, out) layout
        w2=pad2(params["w2"], Dp, Dp).astype(cdt),
        b1=pad2(params["b1"], 1, Dp).astype(jnp.float32),
        b2=pad2(params["b2"], 1, Dp).astype(jnp.float32),
        g1=pad2(params["g1"], 1, Dp).astype(jnp.float32),
        g2=pad2(params["g2"], 1, Dp).astype(jnp.float32),
        be1=pad2(params["be1"], 1, Dp).astype(jnp.float32),
        be2=pad2(params["be2"], 1, Dp).astype(jnp.float32),
    )


@functools.partial(jax.jit, static_argnames=("block_rows",))
def linear_resblock(x, prepped, *, block_rows=512):
    """x: (B, D); prepped: output of prepare_params(). Streams x/out in x.dtype
    (pass bf16 x to halve activation HBM traffic); LN/residual math is f32."""
    B, D = x.shape
    Dp = prepped["w1"].shape[0]
    cdt = prepped["w1"].dtype

    # Feature-pad only (no batch pad, no batch slice on the way out).
    xp = x if Dp == D else jnp.pad(x, ((0, 0), (0, Dp - D)))

    # Batch tile: multiple of 8 rows, capped by block_rows; ensure >= 2 grid
    # steps when B >= 16 so both v7x TensorCores get work.
    TB = min(_round_up(block_rows, 8), _round_up(B, 8))
    if B >= 16 and pl.cdiv(B, TB) < 2:
        TB = _round_up(pl.cdiv(B, 2), 8)
    grid = (pl.cdiv(B, TB),)

    kernel = _make_kernel(D, Dp, cdt)

    io_bytes = jnp.dtype(x.dtype).itemsize
    w_bytes = jnp.dtype(cdt).itemsize
    vmem_need = (
        2 * Dp * Dp * w_bytes          # single-buffered resident weights
        + 6 * 8 * Dp * 4               # bias/gamma/beta rows (8-sublane padded)
        + 2 * 2 * TB * Dp * io_bytes   # double-buffered x-in / out tiles
        + 3 * TB * Dp * 4              # live f32 intermediates (h, c, h2)
        + (2 << 20)                    # slack
    )
    vmem_limit = int(min(_vmem_cap_bytes(), max(32 << 20, vmem_need)))
    # TODO(synk): for very large D (resident bf16 weights exceeding the VMEM
    # cap, e.g. Dp >~ 4k on v7x) fall back to streaming the weights from HBM
    # (memory_space=pl.ANY + pltpu.emit_pipeline over the contraction dim)
    # instead of keeping both resident.

    def resident(shape):
        # Constant block index + Buffered(1): one VMEM copy, resident across steps.
        return pl.BlockSpec(shape, lambda i: (0, 0), pipeline_mode=pl.Buffered(1))

    out = pl.pallas_call(
        kernel,
        out_shape=jax.ShapeDtypeStruct((B, Dp), x.dtype),
        grid=grid,
        in_specs=[
            pl.BlockSpec((TB, Dp), lambda i: (i, 0)),  # x tiles (pipelined)
            resident((Dp, Dp)),                        # W1^T (VMEM-resident)
            resident((1, Dp)),                         # b1
            resident((1, Dp)),                         # gamma1
            resident((1, Dp)),                         # beta1
            resident((Dp, Dp)),                        # W2^T (VMEM-resident)
            resident((1, Dp)),                         # b2
            resident((1, Dp)),                         # gamma2
            resident((1, Dp)),                         # beta2
        ],
        out_specs=pl.BlockSpec((TB, Dp), lambda i: (i, 0)),
        compiler_params=pltpu.CompilerParams(
            dimension_semantics=("parallel",),
            vmem_limit_bytes=vmem_limit,
        ),
        cost_estimate=pl.CostEstimate(
            flops=int(2 * 2 * B * Dp * Dp),
            transcendentals=int(2 * B),
            bytes_accessed=int(2 * B * Dp * io_bytes
                               + 2 * Dp * Dp * w_bytes + 6 * Dp * 4),
        ),
    )(xp, prepped["w1"], prepped["b1"], prepped["g1"], prepped["be1"],
      prepped["w2"], prepped["b2"], prepped["g2"], prepped["be2"])

    return out if Dp == D else out[:, :D]


def init_params(key, dim):
    """Deterministic synthetic init matching nn.Linear / nn.LayerNorm shapes."""
    ks = jax.random.split(key, 4)
    bound = 1.0 / jnp.sqrt(dim)
    # PyTorch Linear weight is (out, in); store transposed (in, out).
    w1 = jax.random.uniform(ks[0], (dim, dim), jnp.float32, -bound, bound)
    b1 = jax.random.uniform(ks[1], (1, dim), jnp.float32, -bound, bound)
    w2 = jax.random.uniform(ks[2], (dim, dim), jnp.float32, -bound, bound)
    b2 = jax.random.uniform(ks[3], (1, dim), jnp.float32, -bound, bound)
    # LayerNorm default init: weight=1, bias=0.
    g1 = jnp.ones((1, dim), jnp.float32)
    be1 = jnp.zeros((1, dim), jnp.float32)
    g2 = jnp.ones((1, dim), jnp.float32)
    be2 = jnp.zeros((1, dim), jnp.float32)
    return dict(w1=w1, b1=b1, g1=g1, be1=be1, w2=w2, b2=b2, g2=g2, be2=be2)


def reference(x, p):
    h = x @ p["w1"] + p["b1"]
    mu = h.mean(-1, keepdims=True)
    var = ((h - mu) ** 2).mean(-1, keepdims=True)
    h = (h - mu) / jnp.sqrt(var + EPS) * p["g1"] + p["be1"]
    h = jnp.maximum(h, 0.0)
    h2 = h @ p["w2"] + p["b2"]
    mu2 = h2.mean(-1, keepdims=True)
    var2 = ((h2 - mu2) ** 2).mean(-1, keepdims=True)
    h2 = (h2 - mu2) / jnp.sqrt(var2 + EPS) * p["g2"] + p["be2"]
    return jnp.maximum(h2 + x, 0.0)


if __name__ == "__main__":
    key = jax.random.PRNGKey(0)
    kx, kx2, kp = jax.random.split(key, 3)

    batch, dim = 8, 32
    x = jax.random.normal(kx, (batch, dim), jnp.float32)
    params = init_params(kp, dim)
    ref = reference(x, params)

    # One-time param prep (pad to lane-dense Dp, cast weights to MXU dtype).
    prepped_f32 = prepare_params(params, compute_dtype=jnp.float32)
    prepped_bf16 = prepare_params(params, compute_dtype=jnp.bfloat16)

    # 1) f32 MXU path: exact check against the reference.
    out_f32 = jax.block_until_ready(linear_resblock(x, prepped_f32))
    assert out_f32.shape == (batch, dim)
    assert jnp.allclose(out_f32, ref, atol=1e-5, rtol=1e-5), "f32 mismatch"

    # 2) bf16 MXU path (v6e/v7x fast path): looser tolerance for bf16 operands.
    out_bf16 = jax.block_until_ready(linear_resblock(x, prepped_bf16))
    assert jnp.allclose(out_bf16, ref, atol=1e-1, rtol=1e-1), "bf16 mismatch"

    # 3) bf16 I/O streaming path (halved activation HBM traffic).
    x_bf16 = x.astype(jnp.bfloat16)
    out_io = jax.block_until_ready(linear_resblock(x_bf16, prepped_bf16))
    assert out_io.dtype == jnp.bfloat16
    assert jnp.allclose(out_io.astype(jnp.float32), ref, atol=2e-1, rtol=2e-1), \
        "bf16-io mismatch"

    # 4) Ragged multi-step grid (3 steps, last block partial, D 32->128 pad).
    x2 = jax.random.normal(kx2, (20, dim), jnp.float32)
    ref2 = reference(x2, params)
    out2 = jax.block_until_ready(linear_resblock(x2, prepped_f32, block_rows=8))
    assert out2.shape == (20, dim)
    assert jnp.allclose(out2, ref2, atol=1e-5, rtol=1e-5), "tiled mismatch"

    # 5) Default tile: TB auto-split so the grid has 2 steps (v7x dual-TC path).
    out3 = jax.block_until_ready(linear_resblock(x2, prepped_f32))
    assert jnp.allclose(out3, ref2, atol=1e-5, rtol=1e-5), "split-tile mismatch"

    print("KERNEL_OK")
</pallas_src>

<mosaic_0001>
module attributes {stable_mosaic.version = 11 : i64} {
  func.func @kernel(%arg0: i32, %arg1: memref<8x128xf32, #tpu.memory_space<vmem>>, %arg2: memref<128x128xf32, #tpu.memory_space<vmem>>, %arg3: memref<1x128xf32, #tpu.memory_space<vmem>>, %arg4: memref<1x128xf32, #tpu.memory_space<vmem>>, %arg5: memref<1x128xf32, #tpu.memory_space<vmem>>, %arg6: memref<128x128xf32, #tpu.memory_space<vmem>>, %arg7: memref<1x128xf32, #tpu.memory_space<vmem>>, %arg8: memref<1x128xf32, #tpu.memory_space<vmem>>, %arg9: memref<1x128xf32, #tpu.memory_space<vmem>>, %arg10: memref<8x128xf32, #tpu.memory_space<vmem>>) attributes {dimension_semantics = [#tpu.dimension_semantics<parallel>], iteration_bounds = array<i64: 1>, scalar_prefetch = 0 : i64, scratch_operands = 0 : i64, tpu.core_type = #tpu.core_type<tc>, window_params = [{transform_indices = @transform_0, window_bounds = array<i64: 8, 128>}, {pipeline_mode = #tpu.pipeline_mode<synchronous>, transform_indices = @transform_1, window_bounds = array<i64: 128, 128>}, {pipeline_mode = #tpu.pipeline_mode<synchronous>, transform_indices = @transform_2, window_bounds = array<i64: 1, 128>}, {pipeline_mode = #tpu.pipeline_mode<synchronous>, transform_indices = @transform_3, window_bounds = array<i64: 1, 128>}, {pipeline_mode = #tpu.pipeline_mode<synchronous>, transform_indices = @transform_4, window_bounds = array<i64: 1, 128>}, {pipeline_mode = #tpu.pipeline_mode<synchronous>, transform_indices = @transform_5, window_bounds = array<i64: 128, 128>}, {pipeline_mode = #tpu.pipeline_mode<synchronous>, transform_indices = @transform_6, window_bounds = array<i64: 1, 128>}, {pipeline_mode = #tpu.pipeline_mode<synchronous>, transform_indices = @transform_7, window_bounds = array<i64: 1, 128>}, {pipeline_mode = #tpu.pipeline_mode<synchronous>, transform_indices = @transform_8, window_bounds = array<i64: 1, 128>}, {transform_indices = @transform_9, window_bounds = array<i64: 8, 128>}]} {
    %0 = tpu.iota {dimensions = array<i32: 1>} : vector<1x128xi32>
    %c32_i32 = arith.constant 32 : i32
    %1 = vector.broadcast %c32_i32 : i32 to vector<1x128xi32>
    %2 = arith.cmpi slt, %0, %1 : vector<1x128xi32>
    %c0 = arith.constant 0 : index
    %c0_0 = arith.constant 0 : index
    %3 = vector.load %arg1[%c0, %c0_0] : memref<8x128xf32, #tpu.memory_space<vmem>>, vector<8x128xf32>
    %c0_1 = arith.constant 0 : index
    %c0_2 = arith.constant 0 : index
    %4 = vector.load %arg2[%c0_1, %c0_2] : memref<128x128xf32, #tpu.memory_space<vmem>>, vector<128x128xf32>
    %cst = arith.constant dense<0.000000e+00> : vector<8x128xf32>
    %5 = tpu.matmul %3, %4, %cst {dimension_numbers = #tpu.dot_dimension_numbers<[1], [0], [0], [1], [0, 0, 1, 1], [], []>} : vector<8x128xf32>, vector<128x128xf32>, vector<8x128xf32> -> vector<8x128xf32>
    %c0_3 = arith.constant 0 : index
    %c0_4 = arith.constant 0 : index
    %6 = vector.load %arg3[%c0_3, %c0_4] : memref<1x128xf32, #tpu.memory_space<vmem>>, vector<1x128xf32>
    %7 = vector.broadcast %6 : vector<1x128xf32> to vector<8x128xf32>
    %8 = arith.addf %5, %7 : vector<8x128xf32>
    %c0_5 = arith.constant 0 : index
    %c0_6 = arith.constant 0 : index
    %9 = vector.load %arg4[%c0_5, %c0_6] : memref<1x128xf32, #tpu.memory_space<vmem>>, vector<1x128xf32>
    %c0_7 = arith.constant 0 : index
    %c0_8 = arith.constant 0 : index
    %10 = vector.load %arg5[%c0_7, %c0_8] : memref<1x128xf32, #tpu.memory_space<vmem>>, vector<1x128xf32>
    %cst_9 = arith.constant dense<0.000000e+00> : vector<8xf32>
    %11 = vector.multi_reduction <add>, %8, %cst_9 [1] : vector<8x128xf32> to vector<8xf32>
    %12 = vector.shape_cast %11 : vector<8xf32> to vector<8x1xf32>
    %cst_10 = arith.constant 3.125000e-02 : f32
    %13 = vector.broadcast %cst_10 : f32 to vector<8x1xf32>
    %14 = arith.mulf %12, %13 : vector<8x1xf32>
    %15 = vector.broadcast %14 : vector<8x1xf32> to vector<8x128xf32>
    %16 = arith.subf %8, %15 : vector<8x128xf32>
    %cst_11 = arith.constant 0.000000e+00 : f32
    %17 = vector.shape_cast %2 : vector<1x128xi1> to vector<1x128xi1>
    %18 = vector.broadcast %17 : vector<1x128xi1> to vector<8x128xi1>
    %19 = vector.broadcast %cst_11 : f32 to vector<8x128xf32>
    %20 = arith.select %18, %16, %19 : vector<8x128xi1>, vector<8x128xf32>
    %21 = arith.mulf %20, %20 : vector<8x128xf32>
    %cst_12 = arith.constant dense<0.000000e+00> : vector<8xf32>
    %22 = vector.multi_reduction <add>, %21, %cst_12 [1] : vector<8x128xf32> to vector<8xf32>
    %23 = vector.shape_cast %22 : vector<8xf32> to vector<8x1xf32>
    %cst_13 = arith.constant 3.125000e-02 : f32
    %24 = vector.broadcast %cst_13 : f32 to vector<8x1xf32>
    %25 = arith.mulf %23, %24 : vector<8x1xf32>
    %cst_14 = arith.constant 9.99999974E-6 : f32
    %26 = vector.broadcast %cst_14 : f32 to vector<8x1xf32>
    %27 = arith.addf %25, %26 : vector<8x1xf32>
    %28 = math.rsqrt %27 : vector<8x1xf32>
    %29 = vector.broadcast %28 : vector<8x1xf32> to vector<8x128xf32>
    %30 = arith.mulf %20, %29 : vector<8x128xf32>
    %31 = vector.broadcast %9 : vector<1x128xf32> to vector<8x128xf32>
    %32 = arith.mulf %30, %31 : vector<8x128xf32>
    %33 = vector.broadcast %10 : vector<1x128xf32> to vector<8x128xf32>
    %34 = arith.addf %32, %33 : vector<8x128xf32>
    %cst_15 = arith.constant 0.000000e+00 : f32
    %35 = vector.broadcast %cst_15 : f32 to vector<8x128xf32>
    %36 = arith.maximumf %34, %35 : vector<8x128xf32>
    %c0_16 = arith.constant 0 : index
    %c0_17 = arith.constant 0 : index
    %37 = vector.load %arg6[%c0_16, %c0_17] : memref<128x128xf32, #tpu.memory_space<vmem>>, vector<128x128xf32>
    %cst_18 = arith.constant dense<0.000000e+00> : vector<8x128xf32>
    %38 = tpu.matmul %36, %37, %cst_18 {dimension_numbers = #tpu.dot_dimension_numbers<[1], [0], [0], [1], [0, 0, 1, 1], [], []>} : vector<8x128xf32>, vector<128x128xf32>, vector<8x128xf32> -> vector<8x128xf32>
    %c0_19 = arith.constant 0 : index
    %c0_20 = arith.constant 0 : index
    %39 = vector.load %arg7[%c0_19, %c0_20] : memref<1x128xf32, #tpu.memory_space<vmem>>, vector<1x128xf32>
    %40 = vector.broadcast %39 : vector<1x128xf32> to vector<8x128xf32>
    %41 = arith.addf %38, %40 : vector<8x128xf32>
    %c0_21 = arith.constant 0 : index
    %c0_22 = arith.constant 0 : index
    %42 = vector.load %arg8[%c0_21, %c0_22] : memref<1x128xf32, #tpu.memory_space<vmem>>, vector<1x128xf32>
    %c0_23 = arith.constant 0 : index
    %c0_24 = arith.constant 0 : index
    %43 = vector.load %arg9[%c0_23, %c0_24] : memref<1x128xf32, #tpu.memory_space<vmem>>, vector<1x128xf32>
    %cst_25 = arith.constant dense<0.000000e+00> : vector<8xf32>
    %44 = vector.multi_reduction <add>, %41, %cst_25 [1] : vector<8x128xf32> to vector<8xf32>
    %45 = vector.shape_cast %44 : vector<8xf32> to vector<8x1xf32>
    %cst_26 = arith.constant 3.125000e-02 : f32
    %46 = vector.broadcast %cst_26 : f32 to vector<8x1xf32>
    %47 = arith.mulf %45, %46 : vector<8x1xf32>
    %48 = vector.broadcast %47 : vector<8x1xf32> to vector<8x128xf32>
    %49 = arith.subf %41, %48 : vector<8x128xf32>
    %cst_27 = arith.constant 0.000000e+00 : f32
    %50 = vector.shape_cast %2 : vector<1x128xi1> to vector<1x128xi1>
    %51 = vector.broadcast %50 : vector<1x128xi1> to vector<8x128xi1>
    %52 = vector.broadcast %cst_27 : f32 to vector<8x128xf32>
    %53 = arith.select %51, %49, %52 : vector<8x128xi1>, vector<8x128xf32>
    %54 = arith.mulf %53, %53 : vector<8x128xf32>
    %cst_28 = arith.constant dense<0.000000e+00> : vector<8xf32>
    %55 = vector.multi_reduction <add>, %54, %cst_28 [1] : vector<8x128xf32> to vector<8xf32>
    %56 = vector.shape_cast %55 : vector<8xf32> to vector<8x1xf32>
    %cst_29 = arith.constant 3.125000e-02 : f32
    %57 = vector.broadcast %cst_29 : f32 to vector<8x1xf32>
    %58 = arith.mulf %56, %57 : vector<8x1xf32>
    %cst_30 = arith.constant 9.99999974E-6 : f32
    %59 = vector.broadcast %cst_30 : f32 to vector<8x1xf32>
    %60 = arith.addf %58, %59 : vector<8x1xf32>
    %61 = math.rsqrt %60 : vector<8x1xf32>
    %62 = vector.broadcast %61 : vector<8x1xf32> to vector<8x128xf32>
    %63 = arith.mulf %53, %62 : vector<8x128xf32>
    %64 = vector.broadcast %42 : vector<1x128xf32> to vector<8x128xf32>
    %65 = arith.mulf %63, %64 : vector<8x128xf32>
    %66 = vector.broadcast %43 : vector<1x128xf32> to vector<8x128xf32>
    %67 = arith.addf %65, %66 : vector<8x128xf32>
    %c0_31 = arith.constant 0 : index
    %c0_32 = arith.constant 0 : index
    %68 = vector.load %arg1[%c0_31, %c0_32] : memref<8x128xf32, #tpu.memory_space<vmem>>, vector<8x128xf32>
    %69 = arith.addf %67, %68 : vector<8x128xf32>
    %cst_33 = arith.constant 0.000000e+00 : f32
    %70 = vector.broadcast %cst_33 : f32 to vector<8x128xf32>
    %71 = arith.maximumf %69, %70 : vector<8x128xf32>
    %c0_34 = arith.constant 0 : index
    %c0_35 = arith.constant 0 : index
    %72 = vector.load %arg10[%c0_34, %c0_35] : memref<8x128xf32, #tpu.memory_space<vmem>>, vector<8x128xf32>
    tpu.vector_store %arg10[%c0_34, %c0_35], %71 {strides = array<i32>} : memref<8x128xf32, #tpu.memory_space<vmem>>, vector<8x128xf32>,
    return
  }
  func.func @transform_0(%arg0: i32) -> (i32, i32) {
    %c0_i32 = arith.constant 0 : i32
    %c0_i32_0 = arith.constant 0 : i32
    return %arg0, %c0_i32 : i32, i32
  }
  func.func @transform_1(%arg0: i32) -> (i32, i32) {
    %c0_i32 = arith.constant 0 : i32
    %c0_i32_0 = arith.constant 0 : i32
    %c0_i32_1 = arith.constant 0 : i32
    return %c0_i32, %c0_i32_0 : i32, i32
  }
  func.func @transform_2(%arg0: i32) -> (i32, i32) {
    %c0_i32 = arith.constant 0 : i32
    %c0_i32_0 = arith.constant 0 : i32
    %c0_i32_1 = arith.constant 0 : i32
    return %c0_i32, %c0_i32_0 : i32, i32
  }
  func.func @transform_3(%arg0: i32) -> (i32, i32) {
    %c0_i32 = arith.constant 0 : i32
    %c0_i32_0 = arith.constant 0 : i32
    %c0_i32_1 = arith.constant 0 : i32
    return %c0_i32, %c0_i32_0 : i32, i32
  }
  func.func @transform_4(%arg0: i32) -> (i32, i32) {
    %c0_i32 = arith.constant 0 : i32
    %c0_i32_0 = arith.constant 0 : i32
    %c0_i32_1 = arith.constant 0 : i32
    return %c0_i32, %c0_i32_0 : i32, i32
  }
  func.func @transform_5(%arg0: i32) -> (i32, i32) {
    %c0_i32 = arith.constant 0 : i32
    %c0_i32_0 = arith.constant 0 : i32
    %c0_i32_1 = arith.constant 0 : i32
    return %c0_i32, %c0_i32_0 : i32, i32
  }
  func.func @transform_6(%arg0: i32) -> (i32, i32) {
    %c0_i32 = arith.constant 0 : i32
    %c0_i32_0 = arith.constant 0 : i32
    %c0_i32_1 = arith.constant 0 : i32
    return %c0_i32, %c0_i32_0 : i32, i32
  }
  func.func @transform_7(%arg0: i32) -> (i32, i32) {
    %c0_i32 = arith.constant 0 : i32
    %c0_i32_0 = arith.constant 0 : i32
    %c0_i32_1 = arith.constant 0 : i32
    return %c0_i32, %c0_i32_0 : i32, i32
  }
  func.func @transform_8(%arg0: i32) -> (i32, i32) {
    %c0_i32 = arith.constant 0 : i32
    %c0_i32_0 = arith.constant 0 : i32
    %c0_i32_1 = arith.constant 0 : i32
    return %c0_i32, %c0_i32_0 : i32, i32
  }
  func.func @transform_9(%arg0: i32) -> (i32, i32) {
    %c0_i32 = arith.constant 0 : i32
    %c0_i32_0 = arith.constant 0 : i32
    return %arg0, %c0_i32 : i32, i32
  }
}

</mosaic_0001>

<bundles_post_ra>
// kernel: linear_resblock.1
= control target key start
LH: loop header
LB: loop body
LE: loop exit
PB: predicated region body
PF: predicated region fallthrough
CT: control target
= control target key end

     0   :  { %14 = vsyncpa [#allocation3], 0  ;;  %s708_s0 = inlined_call_operand.vmem [shape: f32[8,128], index: 0, kind: input, shape index: {}]   ;;  %s709_s1 = inlined_call_operand.hbm [shape: f32[128,128], index: 1, kind: input, shape index: {}]   ;;  %s710_s2 = inlined_call_operand.vmem [shape: f32[1,128], index: 2, kind: input, shape index: {}]   ;;  %s711_s3 = inlined_call_operand.vmem [shape: f32[1,128], index: 3, kind: input, shape index: {}]   ;;  %s712_s4 = inlined_call_operand.vmem [shape: f32[1,128], index: 4, kind: input, shape index: {}]   ;;  %s713_s5 = inlined_call_operand.hbm [shape: f32[128,128], index: 5, kind: input, shape index: {}]   ;;  %s714_s6 = inlined_call_operand.vmem [shape: f32[1,128], index: 6, kind: input, shape index: {}]   ;;  %s715_s7 = inlined_call_operand.vmem [shape: f32[1,128], index: 7, kind: input, shape index: {}]   ;;  %s716_s8 = inlined_call_operand.vmem [shape: f32[1,128], index: 8, kind: input, shape index: {}]   ;;  %s717_s9 = inlined_call_operand.hbm [shape: f32[8,128], index: 9, kind: output, shape index: {}]  }
   0x1   :  { %15 = vsyncpa [#allocation6], 0 }
   0x2   :  { %16 = vsyncpa [#allocation4], 0  ;;  %s571_s30 = smov [#allocation2]   ;;  %s499_s13 = scalar_lea.hbm %s709_s1, 2048 }
   0x3   :  { %s24_s10 = sshll.u32 %s571_s30, 4  ;;  %p500_p0 = scmp.ne.s32.totalorder %s709_s1, %s499_s13  ;;  %s25_s10 = int_to_ptr.vmem [resolvable:$true] %s24_s10 }
   0x4   :  { %p503_p1 = scmp.lt.u32.totalorder %s499_s13, %s709_s1 }
   0x6   :  { %p505_p2 = pnand %p503_p1, %p500_p0 }
   0x8   :  { %508 = shalt.err (!%p505_p2)
}
   0x9   :  { %s509_s18 = scalar_lea.vmem %s25_s10, 2048  ;;  %p514_p4 = scmp.lt.s32.totalorder %s25_s10, %s25_s10 }
   0xa   :  { %p510_p3 = scmp.ne.s32.totalorder %s25_s10, %s509_s18  ;;  %p515_p5 = scmp.lt.s32.totalorder %s509_s18, %s509_s18 }
   0xc   :  { %p516_p6 = por %p515_p5, %p514_p4 }
   0xe   :  { %p517_p7 = pnand %p516_p6, %p510_p3 }
  0x10   :  { %520 = shalt.err (!%p517_p7)
}
  0x11   :  { %s572_s19 = smov 128   ;;  %s573_s20 = smov 8  }
  0x12   :  { %30 = dma.hbm_to_vmem [thread:$0]  %s709_s1, 2048, %s25_s10, [#allocation3], %s572_s19, %s572_s19, %s573_s20  }
  0x13   :  { %s574_s23 = smov [#allocation5]   ;;  %s521_s27 = scalar_lea.hbm %s713_s5, 2048 }
  0x14   :  { %s42_s24 = sshll.u32 %s574_s23, 4  ;;  %p522_p8 = scmp.ne.s32.totalorder %s713_s5, %s521_s27  ;;  %s43_s24 = int_to_ptr.vmem [resolvable:$true] %s42_s24 }
  0x15   :  { %p525_p9 = scmp.lt.u32.totalorder %s521_s27, %s713_s5 }
  0x17   :  { %p527_p10 = pnand %p525_p9, %p522_p8 }
  0x19   :  { %530 = shalt.err (!%p527_p10)
}
  0x1a   :  { %s531_s12 = scalar_lea.vmem %s43_s24, 2048  ;;  %p536_p12 = scmp.lt.s32.totalorder %s43_s24, %s43_s24 }
  0x1b   :  { %p532_p11 = scmp.ne.s32.totalorder %s43_s24, %s531_s12  ;;  %p537_p13 = scmp.lt.s32.totalorder %s531_s12, %s531_s12 }
  0x1d   :  { %p538_p0 = por %p537_p13, %p536_p12 }
  0x1f   :  { %p539_p1 = pnand %p538_p0, %p532_p11 }
  0x21   :  { %542 = shalt.err (!%p539_p1)
}
  0x22   :  { %48 = dma.hbm_to_vmem [thread:$0]  %s713_s5, 2048, %s43_s24, [#allocation6], %s572_s19, %s572_s19, %s573_s20  }
  0x23   :  { %565 = dma.done.wait [#allocation3], 2048  }
  0x24   :  { %566 = vsyncadd [#allocation3], 4294965248 }
  0x25   :  { %567 = dma.done.wait [#allocation6], 2048  }
  0x26   :  { %568 = vsyncadd [#allocation6], 4294965248  ;;  %v575_v0 = vmov 0.0|0.0   ;;  %vm576_vm0 = vmmov 0   ;;  %v577_v1 = vmov 0.0   ;;  %v65_v2 = vld [vmem:[#allocation2] sm:$0xff]  ;;  %v61_v37 = vlaneseq }
  0x27   :  { %439 = vmatprep.subr.bf16.mxu0 %v575_v0  ;;  %401 = vmatprep.mubr.msk.f32.mxu0 %vm576_vm0, %v577_v1  ;;  %v66_v3 = vld [vmem:[#allocation2 + $0x8] sm:$0xff]  ;;  %v67_v4 = vld [vmem:[#allocation2 + $0x10] sm:$0xff]  ;;  %v68_v6 = vld [vmem:[#allocation2 + $0x18] sm:$0xff]  ;;  %s578_s21 = smov [#allocation7]  }
  0x28   :  { %463 = vmatprep.subr.bf16.mxu1 %v575_v0  ;;  %436 = vmatprep.mubr.msk.f32.mxu1 %vm576_vm0, %v577_v1  ;;  %v440_v5 = vpack.c.bf16 %v66_v3, %v65_v2  ;;  %v443_v7 = vpack.c.bf16 %v68_v6, %v67_v4  ;;  %v69_v8 = vld [vmem:[#allocation2 + $0x20] sm:$0xff]  ;;  %v70_v9 = vld [vmem:[#allocation2 + $0x28] sm:$0xff]  ;;  %v71_v11 = vld [vmem:[#allocation2 + $0x30] sm:$0xff]  ;;  %v62_v38 = vand.u32 127, %v61_v37  ;;  %s319_s22 = sshll.u32 %s578_s21, 4  ;;  %s320_s22 = int_to_ptr.vmem [resolvable:$true] %s319_s22 }
  0x29   :  { %v446_v10 = vpack.c.bf16 %v70_v9, %v69_v8  ;;  %v72_v12 = vld [vmem:[#allocation2 + $0x38] sm:$0xff]  ;;  %v73_v14 = vld [vmem:[#allocation2 + $0x40] sm:$0xff]  ;;  %v74_v15 = vld [vmem:[#allocation2 + $0x48] sm:$0xff]  ;;  %s543_s23 = scalar_lea.vmem %s320_s22, 128  ;;  %p548_p3 = scmp.lt.s32.totalorder %s320_s22, %s320_s22 }
  0x2a   :  { %441 = vmatpush3.bf16.msra.mxu0 %v440_v5  ;;  %v449_v13 = vpack.c.bf16 %v72_v12, %v71_v11  ;;  %v452_v16 = vpack.c.bf16 %v74_v15, %v73_v14  ;;  %v75_v17 = vld [vmem:[#allocation2 + $0x50] sm:$0xff]  ;;  %v76_v18 = vld [vmem:[#allocation2 + $0x58] sm:$0xff]  ;;  %v77_v20 = vld [vmem:[#allocation2 + $0x60] sm:$0xff]  ;;  %vm63_vm1 = vcmp.lt.s32.totalorder %v62_v38, 32  ;;  %p544_p2 = scmp.ne.s32.totalorder %s320_s22, %s543_s23  ;;  %p549_p4 = scmp.lt.s32.totalorder %s543_s23, %s543_s23 }
  0x2b   :  { %442 = vmatprep.subr.bf16.mxu0 %v575_v0  ;;  %v455_v19 = vpack.c.bf16 %v76_v18, %v75_v17  ;;  %v78_v21 = vld [vmem:[#allocation2 + $0x68] sm:$0xff]  ;;  %v79_v23 = vld [vmem:[#allocation2 + $0x70] sm:$0xff]  ;;  %v80_v24 = vld [vmem:[#allocation2 + $0x78] sm:$0xff] }
  0x2c   :  { %v458_v22 = vpack.c.bf16 %v78_v21, %v77_v20  ;;  %v461_v25 = vpack.c.bf16 %v80_v24, %v79_v23  ;;  %v665_v26 = vld [vmem:[%s708_s0] sm:$0xff]  ;;  %v190_v32 = vld [vmem:[#allocation5 + $0x8] sm:$0xff]  ;;  %v191_v33 = vld [vmem:[#allocation5 + $0x10] sm:$0xff]  ;;  %p550_p5 = por %p549_p4, %p548_p3 }
  0x2d   :  { %v329_v27 = vld [vmem:[%s710_s2] ss:$0 sm:$0xff]  ;;  %v192_v35 = vld [vmem:[#allocation5 + $0x18] sm:$0xff]  ;;  %v194_v45 = vld [vmem:[#allocation5 + $0x28] sm:$0xff] }
  0x2e   :  { %444 = vmatpush3.bf16.msra.mxu0 %v443_v7  ;;  %v189_v31 = vld [vmem:[#allocation5] sm:$0xff]  ;;  %v467_v36 = vpack.c.bf16 %v192_v35, %v191_v33  ;;  %v195_v47 = vld [vmem:[#allocation5 + $0x30] sm:$0xff]  ;;  %v196_v48 = vld [vmem:[#allocation5 + $0x38] sm:$0xff]  ;;  %p551_p6 = pnand %p550_p5, %p544_p2 }
  0x2f   :  { %445 = vmatprep.subr.bf16.mxu0 %v575_v0  ;;  %v464_v34 = vpack.c.bf16 %v190_v32, %v189_v31  ;;  %v193_v44 = vld [vmem:[#allocation5 + $0x20] sm:$0xff]  ;;  %v473_v49 = vpack.c.bf16 %v196_v48, %v195_v47  ;;  %v198_v51 = vld [vmem:[#allocation5 + $0x48] sm:$0xff]  ;;  %v199_v53 = vld [vmem:[#allocation5 + $0x50] sm:$0xff] }
  0x30   :  { %v470_v46 = vpack.c.bf16 %v194_v45, %v193_v44  ;;  %v197_v50 = vld [vmem:[#allocation5 + $0x40] sm:$0xff]  ;;  %v200_v54 = vld [vmem:[#allocation5 + $0x58] sm:$0xff]  ;;  %v202_v57 = vld [vmem:[#allocation5 + $0x68] sm:$0xff] }
  0x31   :  { %465 = vmatpush3.bf16.msra.mxu1 %v464_v34  ;;  %v476_v52 = vpack.c.bf16 %v198_v51, %v197_v50  ;;  %v479_v55 = vpack.c.bf16 %v200_v54, %v199_v53  ;;  %v201_v56 = vld [vmem:[#allocation5 + $0x60] sm:$0xff]  ;;  %v203_v59 = vld [vmem:[#allocation5 + $0x70] sm:$0xff]  ;;  %v204_v60 = vld [vmem:[#allocation5 + $0x78] sm:$0xff] }
  0x32   :  { %447 = vmatpush3.bf16.msra.mxu0 %v446_v10  ;;  %466 = vmatprep.subr.bf16.mxu1 %v575_v0  ;;  %v482_v58 = vpack.c.bf16 %v202_v57, %v201_v56  ;;  %v485_v61 = vpack.c.bf16 %v204_v60, %v203_v59  ;;  %v330_v3 = vld [vmem:[%s711_s3] ss:$0 sm:$0xff] }
  0x33   :  { %448 = vmatprep.subr.bf16.mxu0 %v575_v0  ;;  %v331_v5 = vld [vmem:[%s712_s4] ss:$0 sm:$0xff] }
  0x34   :  { %v333_v21 = vld [vmem:[%s715_s7] ss:$0 sm:$0xff] }
  0x35   :  { %468 = vmatpush3.bf16.msra.mxu1 %v467_v36  ;;  %v334_v23 = vld [vmem:[%s716_s8] ss:$0 sm:$0xff] }
  0x36   :  { %450 = vmatpush3.bf16.msra.mxu0 %v449_v13  ;;  %469 = vmatprep.subr.bf16.mxu1 %v575_v0 }
  0x37   :  { %451 = vmatprep.subr.bf16.mxu0 %v575_v0 }
  0x39   :  { %471 = vmatpush3.bf16.msra.mxu1 %v470_v46 }
  0x3a   :  { %453 = vmatpush3.bf16.msra.mxu0 %v452_v16  ;;  %472 = vmatprep.subr.bf16.mxu1 %v575_v0 }
  0x3b   :  { %454 = vmatprep.subr.bf16.mxu0 %v575_v0 }
  0x3d   :  { %474 = vmatpush3.bf16.msra.mxu1 %v473_v49 }
  0x3e   :  { %456 = vmatpush3.bf16.msra.mxu0 %v455_v19  ;;  %475 = vmatprep.subr.bf16.mxu1 %v575_v0 }
  0x3f   :  { %457 = vmatprep.subr.bf16.mxu0 %v575_v0 }
  0x41   :  { %477 = vmatpush3.bf16.msra.mxu1 %v476_v52 }
  0x42   :  { %459 = vmatpush3.bf16.msra.mxu0 %v458_v22  ;;  %478 = vmatprep.subr.bf16.mxu1 %v575_v0 }
  0x43   :  { %460 = vmatprep.subr.bf16.mxu0 %v575_v0 }
  0x45   :  { %480 = vmatpush3.bf16.msra.mxu1 %v479_v55 }
  0x46   :  { %462 = vmatpush3.bf16.msra.mxu0 %v461_v25  ;;  %481 = vmatprep.subr.bf16.mxu1 %v575_v0 }
  0x49   :  { %402 = vmatmul.mubr.f32.vlgmr.msra.gmra.mrb[0].mxu0 %v665_v26  ;;  %483 = vmatpush3.bf16.msra.mxu1 %v482_v58 }
  0x4a   :  { %484 = vmatprep.subr.bf16.mxu1 %v575_v0  ;;  %v332_v0 = vld [vmem:[%s714_s6] ss:$0 sm:$0xff] }
  0x4d   :  { %486 = vmatpush3.bf16.msra.mxu1 %v485_v61 }
 0x11c   :  { %v154_v28 = vpop.f32.mrb[0].mxu0 }
 0x11d   :  { %v155_v29 = vadd.f32 %v329_v27, %v154_v28  ;;  %v403_v30 = vpop.f32.mrb[1].mxu0 }
 0x11f   :  { %160 = vadd.xlane.f32.xlu0 %v155_v29 }
 0x1ac   :  { %v161_v39 = vpop.xlane.xlu0 %160 }
 0x1ad   :  { %v162_v40 = vmul.f32 0.03125, %v161_v39 }
 0x1af   :  { %v163_v41 = vsub.f32 %v155_v29, %v162_v40 }
 0x1b1   :  { %v166_v42 = vsel %vm63_vm1, %v163_v41, 0.0 }
 0x1b2   :  { %v167_v43 = vmul.f32 %v166_v42, %v166_v42 }
 0x1b4   :  { %168 = vadd.xlane.f32.xlu0 %v167_v43 }
 0x241   :  { %v169_v62 = vpop.xlane.xlu0 %168 }
 0x242   :  { %v170_v63 = vmul.f32 0.03125, %v169_v62 }
 0x244   :  { %v171_v1 = vadd.f32 1e-05, %v170_v63 }
 0x246   :  { %495 = vrsqrt.f32 %v171_v1 }
 0x250   :  { %v496_v2 = vpop.eup %495 }
 0x251   :  { %v173_v4 = vmul.f32 %v496_v2, %v166_v42 }
 0x253   :  { %v180_v6 = vmul.f32 %v330_v3, %v173_v4 }
 0x255   :  { %v187_v7 = vadd.f32 %v331_v5, %v180_v6 }
 0x257   :  { %v188_v8 = vmax.f32 %v187_v7, 0.0 }
 0x259   :  { %437 = vmatmul.mubr.f32.vlgmr.msra.gmra.mrb[0].mxu1 %v188_v8 }
 0x32c   :  { %v278_v9 = vpop.f32.mrb[0].mxu1 }
 0x32d   :  { %v279_v10 = vadd.f32 %v332_v0, %v278_v9  ;;  %v438_v11 = vpop.f32.mrb[1].mxu1 }
 0x32f   :  { %284 = vadd.xlane.f32.xlu1 %v279_v10 }
 0x3bc   :  { %v285_v12 = vpop.xlane.xlu1 %284 }
 0x3bd   :  { %v286_v13 = vmul.f32 0.03125, %v285_v12 }
 0x3bf   :  { %v287_v14 = vsub.f32 %v279_v10, %v286_v13 }
 0x3c1   :  { %v288_v15 = vsel %vm63_vm1, %v287_v14, 0.0 }
 0x3c2   :  { %v289_v16 = vmul.f32 %v288_v15, %v288_v15 }
 0x3c4   :  { %290 = vadd.xlane.f32.xlu1 %v289_v16 }
 0x451   :  { %v291_v17 = vpop.xlane.xlu1 %290 }
 0x452   :  { %v292_v18 = vmul.f32 0.03125, %v291_v17 }
 0x454   :  { %v293_v19 = vadd.f32 1e-05, %v292_v18 }
 0x456   :  { %497 = vrsqrt.f32 %v293_v19 }
 0x460   :  { %v498_v20 = vpop.eup %497 }
 0x461   :  { %v295_v22 = vmul.f32 %v498_v20, %v288_v15 }
 0x463   :  { %v302_v24 = vmul.f32 %v333_v21, %v295_v22 }
 0x465   :  { %v309_v25 = vadd.f32 %v334_v23, %v302_v24 }
 0x467   :  { %v310_v27 = vadd.f32 %v309_v25, %v665_v26 }
 0x469   :  { %v311_v28 = vmax.f32 %v310_v27, 0.0 }
 0x46b   :  { %312 = vst [vmem:[#allocation7] sm:$0xff] %v311_v28 }
 0x46c   :  { %554 = shalt.err (!%p551_p6)
}
 0x46d   :  { %s555_s8 = scalar_lea.hbm %s717_s9, 128 }
 0x46e   :  { %p556_p7 = scmp.ne.s32.totalorder %s717_s9, %s555_s8  ;;  %p559_p8 = scmp.lt.u32.totalorder %s555_s8, %s717_s9 }
 0x470   :  { %p561_p9 = pnand %p559_p8, %p556_p7 }
 0x472   :  { %564 = shalt.err (!%p561_p9)
}
 0x473   :  { %322 = dma.vmem_to_hbm [thread:$0]  %s320_s22, 128, %s717_s9, [#allocation4]  }
 0x474   :  { %569 = dma.done.wait [#allocation4], 128  }
 0x475   :  { %570 = vsyncadd [#allocation4], 4294967168 }
 0x476   :  { %326 = vsyncpa [#allocation3], 1 }
 0x477   :  { %327 = vsyncpa [#allocation6], 1 }
 0x478   :  { %328 = vsyncpa [#allocation4], 1 }

</bundles_post_ra>
